<compile_context>
chip_gen: v7x
topology: tpu7x:2x2x1
jax: 0.10.0
libtpu: 0.0.40
codegen_flags: <defaults>
</compile_context>

<pallas_src>
import functools

import jax
import jax.numpy as jnp
from jax.experimental import pallas as pl
from jax.experimental.pallas import tpu as pltpu

EPS = 1e-9            # charbonnier epsilon
EPS2 = EPS * EPS      # plain Python float -> inlined literal, NOT a captured constant


def _resize_matrix(out_size: int, in_size: int) -> jnp.ndarray:
    """Row-stochastic matrix implementing 1-D bilinear resize with
    align_corners=False semantics (matches torch.nn.functional.interpolate)."""
    scale = in_size / out_size
    o = jnp.arange(out_size, dtype=jnp.float32)
    src = (o + 0.5) * scale - 0.5
    src = jnp.maximum(src, 0.0)                      # PyTorch clamps negatives to 0
    i0 = jnp.floor(src).astype(jnp.int32)
    i0 = jnp.minimum(i0, in_size - 1)
    i1 = jnp.minimum(i0 + 1, in_size - 1)
    w1 = src - i0.astype(jnp.float32)
    w0 = 1.0 - w1
    cols = jnp.arange(in_size)[None, :]
    W = (w0[:, None] * (cols == i0[:, None]).astype(jnp.float32)
         + w1[:, None] * (cols == i1[:, None]).astype(jnp.float32))
    return W.astype(jnp.float32)


def _largest_divisor_leq(n: int, cap: int) -> int:
    cap = max(1, min(n, cap))
    for d in range(cap, 0, -1):
        if n % d == 0:
            return d
    return 1


def _pixel_loss_kernel(img_ref, rec_ref, wh_ref, wwt_ref, out_ref,
                       *, planes, hin, hout, use_blockdiag):
    # img_ref : (1, planes*Hin,  Win)   native dtype (planes = bn * C)
    # rec_ref : (1, planes*Hout, Wout)  native dtype
    # wh_ref  : block-diag (planes*Hout, planes*Hin) bf16   OR   (Hout, Hin) bf16
    # wwt_ref : (Win, Wout) bf16  (W-resize matrix, pre-transposed on host)
    # out_ref : (1, Wout) f32 partial (charbonnier summed over bn, C, Hout)
    img = img_ref[0].astype(jnp.bfloat16)                       # (planes*Hin, Win)
    rec = rec_ref[0].astype(jnp.float32)                        # (planes*Hout, Wout)

    # W-resize of ALL planes of this step in one MXU matmul.
    tmp = jnp.dot(img, wwt_ref[...],
                  preferred_element_type=jnp.float32)           # (planes*Hin, Wout)
    tmp_bf = tmp.astype(jnp.bfloat16)

    if use_blockdiag:
        # H-resize of all planes as one block-diagonal matmul, then a single
        # batched elementwise charbonnier pass + sublane reduction.
        resized = jnp.dot(wh_ref[...], tmp_bf,
                          preferred_element_type=jnp.float32)   # (planes*Hout, Wout)
        diff = rec - resized
        err = jnp.sqrt(jnp.sqrt(diff * diff + EPS2))            # (x^2 + eps^2)^0.25
        out_ref[...] = jnp.sum(err, axis=0, keepdims=True)      # (1, Wout)
    else:
        # Large-plane fallback: per-plane H-resize (block-diag would be too big),
        # charbonnier accumulated into a single (1, Wout) partial.
        wh = wh_ref[...]                                        # (Hout, Hin) bf16
        acc = jnp.zeros((1, rec.shape[-1]), jnp.float32)
        for p in range(planes):                                 # static unroll
            res_p = jnp.dot(wh, tmp_bf[p * hin:(p + 1) * hin],
                            preferred_element_type=jnp.float32)  # (Hout, Wout)
            d = rec[p * hout:(p + 1) * hout] - res_p
            acc = acc + jnp.sum(jnp.sqrt(jnp.sqrt(d * d + EPS2)),
                                axis=0, keepdims=True)
        out_ref[...] = acc


@functools.partial(jax.jit, static_argnames=("blockdiag_k_limit",))
def pixel_loss(images, reconstructed_images, *, blockdiag_k_limit=1024):
    """JAX/Pallas equivalent of Pixel_Loss.forward(images, reconstructed_images)."""
    N, C, Hin, Win = images.shape
    Nr, Cr, Hout, Wout = reconstructed_images.shape
    assert (N, C) == (Nr, Cr)

    # --- pick how many batch elements to fold into one grid step ------------------
    rows_per_item = C * Hin
    bn_mxu = max(1, 512 // rows_per_item)                       # target a few hundred M rows
    bn_vmem = max(1, int((6 << 20) // (C * (Hin * Win + 5 * Hout * Wout) * 4)))
    bn = _largest_divisor_leq(N, min(bn_mxu, bn_vmem))
    steps = N // bn
    planes = bn * C
    Mh_in = planes * Hin
    Mh_out = planes * Hout

    # Free HBM reshapes: fold (bn, C, H) into the matmul M dimension per grid step.
    img3 = images.reshape(steps, Mh_in, Win)
    rec3 = reconstructed_images.reshape(steps, Mh_out, Wout)

    # Resize matrices built in f32, stored/fed to the MXU in bf16.
    wh = _resize_matrix(Hout, Hin)                              # (Hout, Hin)
    wwt = _resize_matrix(Wout, Win).T.astype(jnp.bfloat16)      # (Win, Wout)

    whbd_bytes = Mh_out * Mh_in * 2
    use_blockdiag = (Mh_in <= blockdiag_k_limit) and (whbd_bytes <= (4 << 20))
    if use_blockdiag:
        wh_arg = jnp.kron(jnp.eye(planes, dtype=jnp.float32), wh).astype(jnp.bfloat16)
        wh_block = (Mh_out, Mh_in)
    else:
        wh_arg = wh.astype(jnp.bfloat16)
        wh_block = (Hout, Hin)

    # --- VMEM budget: only raise the scoped limit if the blocks actually need it --
    block_bytes = (2 * Mh_in * Win * images.dtype.itemsize
                   + 2 * Mh_out * Wout * reconstructed_images.dtype.itemsize
                   + 2 * wh_arg.size * 2 + 2 * wwt.size * 2
                   + 2 * Wout * 4)
    scratch_bytes = (Mh_in * Win * 2                # img bf16
                     + Mh_in * Wout * (4 + 2)       # tmp f32 + bf16
                     + Mh_out * Wout * 4 * 3)       # rec/resized/err f32
    vmem_needed = block_bytes + scratch_bytes
    vmem_limit = None
    if vmem_needed > (16 << 20):
        vmem_limit = int(min(vmem_needed + (8 << 20), 100 << 20))
    # TODO(synk): for very large planes (e.g. 1024x1024 upsampling) add an Hout tiling
    # grid axis (block rec/out/wh on Hout) instead of relying on vmem_limit_bytes alone.

    kernel = functools.partial(_pixel_loss_kernel, planes=planes, hin=Hin,
                               hout=Hout, use_blockdiag=use_blockdiag)

    partials = pl.pallas_call(
        kernel,
        out_shape=jax.ShapeDtypeStruct((steps, Wout), jnp.float32),
        grid=(steps,),
        in_specs=[
            pl.BlockSpec((1, Mh_in, Win), lambda s: (s, 0, 0)),
            pl.BlockSpec((1, Mh_out, Wout), lambda s: (s, 0, 0)),
            pl.BlockSpec(wh_block, lambda s: (0, 0)),
            pl.BlockSpec((Win, Wout), lambda s: (0, 0)),
        ],
        out_specs=pl.BlockSpec((1, Wout), lambda s: (s, 0)),
        compiler_params=pltpu.CompilerParams(
            dimension_semantics=("parallel",),      # per-step partials -> megacore-safe
            vmem_limit_bytes=vmem_limit),
    )(img3, rec3, wh_arg, wwt)

    # torch: error = sum(err, dim=1) / 3 ; loss = mean(error over N, Hout, Wout)
    # (/3 is hardcoded in the PyTorch module, independent of C)
    return jnp.sum(partials) / jnp.float32(3.0 * N * Hout * Wout)


def pixel_loss_ref(images, reconstructed_images):
    """Pure-JAX f32 reference with identical resize semantics."""
    N, C, Hin, Win = images.shape
    _, _, Hout, Wout = reconstructed_images.shape
    wh = _resize_matrix(Hout, Hin)
    ww = _resize_matrix(Wout, Win)
    resized = jnp.einsum('oh,nchw,pw->ncop', wh, images.astype(jnp.float32), ww)
    diff = reconstructed_images.astype(jnp.float32) - resized
    err = jnp.sqrt(jnp.sqrt(diff * diff + jnp.float32(EPS * EPS)))
    err = jnp.sum(err, axis=1) / 3.0
    return jnp.mean(err)


if __name__ == "__main__":
    key = jax.random.PRNGKey(0)
    k1, k2 = jax.random.split(key)
    # images at a lower resolution, reconstructed at the target resolution
    images = jax.random.normal(k1, (2, 3, 12, 12), dtype=jnp.float32)
    reconstructed = jax.random.normal(k2, (2, 3, 16, 16), dtype=jnp.float32)

    ref = pixel_loss_ref(images, reconstructed)

    # Main path: batched W-resize + block-diagonal H-resize (bf16 MXU, f32 acc).
    loss = jax.block_until_ready(pixel_loss(images, reconstructed))
    assert jnp.allclose(loss, ref, rtol=5e-3, atol=1e-4), (loss, ref)

    # Also exercise the per-plane (large-plane) fallback path for the H-resize.
    loss_fb = jax.block_until_ready(pixel_loss(images, reconstructed,
                                               blockdiag_k_limit=0))
    assert jnp.allclose(loss_fb, ref, rtol=5e-3, atol=1e-4), (loss_fb, ref)

    print("KERNEL_OK")
</pallas_src>

<mosaic_0001>
module attributes {stable_mosaic.version = 11 : i64} {
  func.func @_pixel_loss_kernel(%arg0: i32, %arg1: memref<1x72x12xf32, #tpu.memory_space<vmem>>, %arg2: memref<1x96x16xf32, #tpu.memory_space<vmem>>, %arg3: memref<96x72xbf16, #tpu.memory_space<vmem>>, %arg4: memref<12x16xbf16, #tpu.memory_space<vmem>>, %arg5: memref<1x16xf32, #tpu.memory_space<vmem>>) attributes {dimension_semantics = [#tpu.dimension_semantics<parallel>], iteration_bounds = array<i64: 1>, scalar_prefetch = 0 : i64, scratch_operands = 0 : i64, tpu.core_type = #tpu.core_type<tc>, window_params = [{transform_indices = @transform_0, window_bounds = array<i64: 1, 72, 12>}, {transform_indices = @transform_1, window_bounds = array<i64: 1, 96, 16>}, {pipeline_mode = #tpu.pipeline_mode<synchronous>, transform_indices = @transform_2, window_bounds = array<i64: 96, 72>}, {pipeline_mode = #tpu.pipeline_mode<synchronous>, transform_indices = @transform_3, window_bounds = array<i64: 12, 16>}, {transform_indices = @transform_4, window_bounds = array<i64: 1, 16>}]} {
    %c0 = arith.constant 0 : index
    %c0_0 = arith.constant 0 : index
    %c0_1 = arith.constant 0 : index
    %0 = vector.load %arg1[%c0, %c0_0, %c0_1] : memref<1x72x12xf32, #tpu.memory_space<vmem>>, vector<1x72x12xf32>
    %1 = vector.shape_cast %0 : vector<1x72x12xf32> to vector<72x12xf32>
    %2 = arith.truncf %1 : vector<72x12xf32> to vector<72x12xbf16>
    %c0_2 = arith.constant 0 : index
    %c0_3 = arith.constant 0 : index
    %c0_4 = arith.constant 0 : index
    %3 = vector.load %arg2[%c0_2, %c0_3, %c0_4] : memref<1x96x16xf32, #tpu.memory_space<vmem>>, vector<1x96x16xf32>
    %4 = vector.shape_cast %3 : vector<1x96x16xf32> to vector<96x16xf32>
    %c0_5 = arith.constant 0 : index
    %c0_6 = arith.constant 0 : index
    %5 = vector.load %arg4[%c0_5, %c0_6] : memref<12x16xbf16, #tpu.memory_space<vmem>>, vector<12x16xbf16>
    %cst = arith.constant dense<0.000000e+00> : vector<72x16xf32>
    %6 = tpu.matmul %2, %5, %cst {dimension_numbers = #tpu.dot_dimension_numbers<[1], [0], [0], [1], [0, 0, 1, 1], [], []>} : vector<72x12xbf16>, vector<12x16xbf16>, vector<72x16xf32> -> vector<72x16xf32>
    %7 = arith.truncf %6 : vector<72x16xf32> to vector<72x16xbf16>
    %c0_7 = arith.constant 0 : index
    %c0_8 = arith.constant 0 : index
    %8 = vector.load %arg3[%c0_7, %c0_8] : memref<96x72xbf16, #tpu.memory_space<vmem>>, vector<96x72xbf16>
    %cst_9 = arith.constant dense<0.000000e+00> : vector<96x16xf32>
    %9 = tpu.matmul %8, %7, %cst_9 {dimension_numbers = #tpu.dot_dimension_numbers<[1], [0], [0], [1], [0, 0, 1, 1], [], []>} : vector<96x72xbf16>, vector<72x16xbf16>, vector<96x16xf32> -> vector<96x16xf32>
    %10 = arith.subf %4, %9 : vector<96x16xf32>
    %11 = arith.mulf %10, %10 : vector<96x16xf32>
    %cst_10 = arith.constant 1.000000e-18 : f32
    %12 = vector.broadcast %cst_10 : f32 to vector<96x16xf32>
    %13 = arith.addf %11, %12 : vector<96x16xf32>
    %14 = math.sqrt %13 : vector<96x16xf32>
    %15 = math.sqrt %14 : vector<96x16xf32>
    %cst_11 = arith.constant dense<0.000000e+00> : vector<16xf32>
    %16 = vector.multi_reduction <add>, %15, %cst_11 [0] : vector<96x16xf32> to vector<16xf32>
    %17 = vector.shape_cast %16 : vector<16xf32> to vector<1x16xf32>
    %c0_12 = arith.constant 0 : index
    %c0_13 = arith.constant 0 : index
    %18 = vector.load %arg5[%c0_12, %c0_13] : memref<1x16xf32, #tpu.memory_space<vmem>>, vector<1x16xf32>
    tpu.vector_store %arg5[%c0_12, %c0_13], %17 {strides = array<i32>} : memref<1x16xf32, #tpu.memory_space<vmem>>, vector<1x16xf32>,
    return
  }
  func.func @transform_0(%arg0: i32) -> (i32, i32, i32) {
    %c0_i32 = arith.constant 0 : i32
    %c0_i32_0 = arith.constant 0 : i32
    %c0_i32_1 = arith.constant 0 : i32
    return %arg0, %c0_i32, %c0_i32_0 : i32, i32, i32
  }
  func.func @transform_1(%arg0: i32) -> (i32, i32, i32) {
    %c0_i32 = arith.constant 0 : i32
    %c0_i32_0 = arith.constant 0 : i32
    %c0_i32_1 = arith.constant 0 : i32
    return %arg0, %c0_i32, %c0_i32_0 : i32, i32, i32
  }
  func.func @transform_2(%arg0: i32) -> (i32, i32) {
    %c0_i32 = arith.constant 0 : i32
    %c0_i32_0 = arith.constant 0 : i32
    %c0_i32_1 = arith.constant 0 : i32
    return %c0_i32, %c0_i32_0 : i32, i32
  }
  func.func @transform_3(%arg0: i32) -> (i32, i32) {
    %c0_i32 = arith.constant 0 : i32
    %c0_i32_0 = arith.constant 0 : i32
    %c0_i32_1 = arith.constant 0 : i32
    return %c0_i32, %c0_i32_0 : i32, i32
  }
  func.func @transform_4(%arg0: i32) -> (i32, i32) {
    %c0_i32 = arith.constant 0 : i32
    %c0_i32_0 = arith.constant 0 : i32
    return %arg0, %c0_i32 : i32, i32
  }
}

</mosaic_0001>

<bundles_post_ra>
// kernel: pixel_loss.1
= control target key start
LH: loop header
LB: loop body
LE: loop exit
PB: predicated region body
PF: predicated region fallthrough
CT: control target
= control target key end

     0   :  { %vm67_vm0 = vcmask 1045504   ;;  %v671_v0 = vmov 0.0   ;;  %vm672_vm1 = vmmov 0   ;;  %vm51_vm2 = vcmask 97280   ;;  %s956_s3 = inlined_call_operand.vmem [shape: bf16[12,16], index: 3, kind: input, shape index: {}]   ;;  %s957_s0 = inlined_call_operand.vmem [shape: f32[1,72,12], index: 0, kind: input, shape index: {}]   ;;  %s958_s2 = inlined_call_operand.vmem [shape: bf16[96,72], index: 2, kind: input, shape index: {}]   ;;  %s959_s1 = inlined_call_operand.vmem [shape: f32[1,96,16], index: 1, kind: input, shape index: {}]   ;;  %s960_s4 = inlined_call_operand.vmem [shape: f32[1,16], index: 4, kind: output, shape index: {}]  }
   0x1   :  { %569 = vmatprep.subr.bf16.mxu0 %v671_v0  ;;  %v616_v1 = vld [vmem:[%s956_s3] sm:$0x3f]   ;;  %571 = vmatprep.mubr.msk.bf16.mxu0 %vm672_vm1, %v671_v0  ;;  %v19_v3 = vld [vmem:[%s957_s0 + $0x8] sm:$0xff]  ;;  %v20_v6 = vld [vmem:[%s957_s0 + $0x10] sm:$0xff]  ;;  %vm190_vm3 = vcmask 588800   ;;  %vm209_vm4 = vcmask 1043456  }
   0x2   :  { %v18_v2 = vld [vmem:[%s957_s0] sm:$0xff]  ;;  %v69_v4 = vsel %vm67_vm0, %v616_v1, 0  ;;  %v21_v7 = vld [vmem:[%s957_s0 + $0x18] sm:$0xff]  ;;  %v23_v10 = vld [vmem:[%s957_s0 + $0x28] sm:$0xff] }
   0x3   :  { %v27_v5 = vpack.c.bf16 %v19_v3, %v18_v2  ;;  %570 = vmatpush3.bf16.msra.mxu0 %v69_v4  ;;  %v28_v8 = vpack.c.bf16 %v21_v7, %v20_v6  ;;  %v22_v9 = vld [vmem:[%s957_s0 + $0x20] sm:$0xff]  ;;  %v24_v12 = vld [vmem:[%s957_s0 + $0x30] sm:$0xff]  ;;  %v25_v13 = vld [vmem:[%s957_s0 + $0x38] sm:$0xff] }
   0x4   :  { %v29_v11 = vpack.c.bf16 %v23_v10, %v22_v9  ;;  %v30_v14 = vpack.c.bf16 %v25_v13, %v24_v12  ;;  %v26_v15 = vld [vmem:[%s957_s0 + $0x40] sm:$0xff]  ;;  %v618_v44 = vld [vmem:[%s958_s2 + $0x8] sm:$0xff]   ;;  %v619_v45 = vld [vmem:[%s958_s2 + $0x10] sm:$0xff]  }
   0x5   :  { %v31_v16 = vpack.c.bf16 %v26_v15, %v26_v15  ;;  %v617_v17 = vld [vmem:[%s958_s2] sm:$0xff]   ;;  %v620_v46 = vld [vmem:[%s958_s2 + $0x18] sm:$0xff]   ;;  %v622_v48 = vld [vmem:[%s958_s2 + $0x28] sm:$0xff]  }
   0x6   :  { %572 = vmatmul.mubr.msk.bf16.vlgmr.msra.gmra.mrb[0].mxu0 %vm51_vm2, %v27_v5  ;;  %601 = vmatprep.mubr.msk.bf16.mxu1 %vm190_vm3, %v617_v17  ;;  %v621_v47 = vld [vmem:[%s958_s2 + $0x20] sm:$0xff]   ;;  %v34_v49 = vld [vmem:[%s959_s1 + $0x10] sm:$0xff]  ;;  %v35_v52 = vld [vmem:[%s959_s1 + $0x18] sm:$0xff] }
   0x7   :  { %575 = vmatprep.mubr.msk.bf16.mxu0 %vm672_vm1, %v671_v0  ;;  %v32_v50 = vld [vmem:[%s959_s1] sm:$0xff]  ;;  %v33_v55 = vld [vmem:[%s959_s1 + $0x8] sm:$0xff]  ;;  %v38_v3 = vld [vmem:[%s959_s1 + $0x30] sm:$0xff] }
   0x8   :  { %v36_v4 = vld [vmem:[%s959_s1 + $0x20] sm:$0xff]  ;;  %v37_v13 = vld [vmem:[%s959_s1 + $0x28] sm:$0xff] }
   0xe   :  { %576 = vmatmul.mubr.msk.bf16.gmra.mrb[4].mxu0 %vm51_vm2, %v28_v8 }
   0xf   :  { %579 = vmatprep.mubr.msk.bf16.mxu0 %vm672_vm1, %v671_v0 }
  0x16   :  { %580 = vmatmul.mubr.msk.bf16.gmra.mrb[8].mxu0 %vm51_vm2, %v29_v11  ;;  %v39_v11 = vld [vmem:[%s959_s1 + $0x38] sm:$0xff] }
  0x17   :  { %583 = vmatprep.mubr.msk.bf16.mxu0 %vm672_vm1, %v671_v0 }
  0x1e   :  { %584 = vmatmul.mubr.msk.bf16.gmra.mrb[12].mxu0 %vm51_vm2, %v30_v14 }
  0x1f   :  { %587 = vmatprep.mubr.msk.bf16.mxu0 %vm672_vm1, %v671_v0 }
  0x26   :  { %588 = vmatmul.mubr.msk.bf16.gmra.mrb[16].mxu0 %vm51_vm2, %v31_v16 }
  0xd9   :  { %v105_v18 = vpop.f32.mrb[0].mxu0 }
  0xda   :  { %v573_v19 = vpop.f32.mrb[1].mxu0 }
  0xdb   :  { %v108_v20 = vpop.f32.mrb[2].mxu0 }
  0xdc   :  { %v143_v21 = vpack.c.bf16 %v108_v20, %v105_v18  ;;  %v574_v22 = vpop.f32.mrb[3].mxu0 }
  0xde   :  { %591 = vmatprep.subr.bf16.mxu1 %v143_v21 }
  0xdf   :  { %592 = vmatpush3.bf16.msra.mxu1 %v143_v21 }
  0xe1   :  { %v113_v23 = vpop.f32.mrb[4].mxu0 }
  0xe2   :  { %v577_v24 = vpop.f32.mrb[5].mxu0 }
  0xe3   :  { %v116_v25 = vpop.f32.mrb[6].mxu0 }
  0xe4   :  { %v144_v26 = vpack.c.bf16 %v116_v25, %v113_v23  ;;  %v578_v27 = vpop.f32.mrb[7].mxu0 }
  0xe6   :  { %593 = vmatprep.subr.bf16.mxu1 %v144_v26 }
  0xe7   :  { %594 = vmatpush3.bf16.msra.mxu1 %v144_v26 }
  0xe9   :  { %v121_v28 = vpop.f32.mrb[8].mxu0 }
  0xea   :  { %v581_v29 = vpop.f32.mrb[9].mxu0 }
  0xeb   :  { %v124_v30 = vpop.f32.mrb[10].mxu0 }
  0xec   :  { %v145_v31 = vpack.c.bf16 %v124_v30, %v121_v28  ;;  %v582_v32 = vpop.f32.mrb[11].mxu0 }
  0xee   :  { %595 = vmatprep.subr.bf16.mxu1 %v145_v31 }
  0xef   :  { %596 = vmatpush3.bf16.msra.mxu1 %v145_v31 }
  0xf1   :  { %v129_v33 = vpop.f32.mrb[12].mxu0 }
  0xf2   :  { %v585_v34 = vpop.f32.mrb[13].mxu0 }
  0xf3   :  { %v132_v35 = vpop.f32.mrb[14].mxu0 }
  0xf4   :  { %v146_v36 = vpack.c.bf16 %v132_v35, %v129_v33  ;;  %v586_v37 = vpop.f32.mrb[15].mxu0 }
  0xf6   :  { %597 = vmatprep.subr.bf16.mxu1 %v146_v36 }
  0xf7   :  { %598 = vmatpush3.bf16.msra.mxu1 %v146_v36 }
  0xf9   :  { %v137_v38 = vpop.f32.mrb[16].mxu0 }
  0xfa   :  { %v147_v39 = vpack.c.bf16 %v137_v38, %v137_v38  ;;  %v589_v40 = vpop.f32.mrb[17].mxu0 }
  0xfb   :  { %v140_v41 = vpop.f32.mrb[18].mxu0 }
  0xfc   :  { %v590_v42 = vpop.f32.mrb[19].mxu0  ;;  %613 = vmatprep.subr.msk.bf16.mxu1 %vm209_vm4, %v147_v39  ;;  %v211_v43 = vsel %vm209_vm4, %v147_v39, 0 }
  0xfd   :  { %600 = vmatpush3.bf16.msra.mxu1 %v211_v43  ;;  %v42_v43 = vld [vmem:[%s959_s1 + $0x50] sm:$0xff] }
 0x100   :  { %602 = vmatmul.mubr.msk.bf16.vlgmr.msra.gmra.mrb[0].mxu1 %vm190_vm3, %v618_v44 }
 0x101   :  { %605 = vmatprep.mubr.msk.bf16.mxu1 %vm190_vm3, %v619_v45 }
 0x108   :  { %606 = vmatmul.mubr.msk.bf16.gmra.mrb[4].mxu1 %vm190_vm3, %v620_v46 }
 0x109   :  { %609 = vmatprep.mubr.msk.bf16.mxu1 %vm190_vm3, %v621_v47 }
 0x110   :  { %610 = vmatmul.mubr.msk.bf16.gmra.mrb[8].mxu1 %vm190_vm3, %v622_v48  ;;  %vm498_vm3 = vcmask 130048  }
 0x1d3   :  { %v603_v51 = vpop.f32.mrb[0].mxu1 }
 0x1d4   :  { %v296_v53 = vsub.f32 %v34_v49, %v603_v51  ;;  %v247_v54 = vpop.f32.mrb[1].mxu1 }
 0x1d5   :  { %v294_v56 = vsub.f32 %v32_v50, %v247_v54  ;;  %v604_v57 = vpop.f32.mrb[2].mxu1 }
 0x1d6   :  { %v308_v58 = vmul.f32 %v296_v53, %v296_v53  ;;  %v297_v59 = vsub.f32 %v35_v52, %v604_v57  ;;  %v250_v60 = vpop.f32.mrb[3].mxu1  ;;  %v40_v52 = vld [vmem:[%s959_s1 + $0x40] sm:$0xff]  ;;  %v43_v53 = vld [vmem:[%s959_s1 + $0x58] sm:$0xff] }
 0x1d7   :  { %v306_v61 = vmul.f32 %v294_v56, %v294_v56  ;;  %v295_v62 = vsub.f32 %v33_v55, %v250_v60 }
 0x1d8   :  { %v320_v63 = vadd.f32 1e-18, %v308_v58  ;;  %v309_v0 = vmul.f32 %v297_v59, %v297_v59 }
 0x1d9   :  { %v318_v1 = vadd.f32 1e-18, %v306_v61  ;;  %v307_v2 = vmul.f32 %v295_v62, %v295_v62 }
 0x1da   :  { %623 = vrsqrt.f32 %v320_v63  ;;  %v321_v6 = vadd.f32 1e-18, %v309_v0  ;;  %vm346_vm5 = vcmp.eq.f32.partialorder %v320_v63, inf  ;;  %v349_v29 = vand.u32 2147483648, %v320_v63 }
 0x1db   :  { %625 = vrsqrt.f32 %v318_v1  ;;  %v607_v5 = vpop.f32.mrb[4].mxu1  ;;  %v319_v7 = vadd.f32 1e-18, %v307_v2  ;;  %vm348_vm6 = vcmp.eq.f32.partialorder %v320_v63, 0.0  ;;  %vm332_vm7 = vcmp.eq.f32.partialorder %v318_v1, inf }
 0x1dc   :  { %v300_v8 = vsub.f32 %v38_v3, %v607_v5  ;;  %v263_v9 = vpop.f32.mrb[5].mxu1  ;;  %627 = vrsqrt.f32 %v321_v6  ;;  %v335_v34 = vand.u32 2147483648, %v318_v1  ;;  %vm334_vm8 = vcmp.eq.f32.partialorder %v318_v1, 0.0 }
 0x1dd   :  { %v298_v10 = vsub.f32 %v36_v4, %v263_v9  ;;  %v608_v12 = vpop.f32.mrb[6].mxu1  ;;  %629 = vrsqrt.f32 %v319_v7  ;;  %vm353_vm9 = vcmp.eq.f32.partialorder %v321_v6, inf  ;;  %vm355_vm10 = vcmp.eq.f32.partialorder %v321_v6, 0.0 }
 0x1de   :  { %v266_v14 = vpop.f32.mrb[7].mxu1  ;;  %v312_v15 = vmul.f32 %v300_v8, %v300_v8  ;;  %v301_v17 = vsub.f32 %v39_v11, %v608_v12  ;;  %v356_v44 = vand.u32 2147483648, %v321_v6  ;;  %vm339_vm11 = vcmp.eq.f32.partialorder %v319_v7, inf }
 0x1df   :  { %v310_v16 = vmul.f32 %v298_v10, %v298_v10  ;;  %v299_v18 = vsub.f32 %v37_v13, %v266_v14  ;;  %v342_v45 = vand.u32 2147483648, %v319_v7  ;;  %vm341_vm12 = vcmp.eq.f32.partialorder %v319_v7, 0.0 }
 0x1e0   :  { %v786_v19 = vadd.f32 1e-18, %v312_v15  ;;  %v313_v21 = vmul.f32 %v301_v17, %v301_v17 }
 0x1e1   :  { %v788_v20 = vadd.f32 1e-18, %v310_v16  ;;  %v311_v24 = vmul.f32 %v299_v18, %v299_v18 }
 0x1e2   :  { %631 = vrsqrt.f32 %v786_v19  ;;  %v792_v31 = vadd.f32 1e-18, %v313_v21  ;;  %vm374_vm13 = vcmp.eq.f32.partialorder %v786_v19, inf  ;;  %vm376_vm14 = vcmp.eq.f32.partialorder %v786_v19, 0.0 }
 0x1e3   :  { %v611_v22 = vpop.f32.mrb[8].mxu1  ;;  %633 = vrsqrt.f32 %v788_v20  ;;  %v799_v38 = vadd.f32 1e-18, %v311_v24  ;;  %v377_v55 = vand.u32 2147483648, %v786_v19  ;;  %vm360_vm15 = vcmp.eq.f32.partialorder %v788_v20, inf }
 0x1e4   :  { %v624_v23 = vpop.eup %623  ;;  %v279_v25 = vpop.f32.mrb[9].mxu1  ;;  %635 = vrsqrt.f32 %v792_v31  ;;  %v304_v50 = vsub.f32 %v42_v43, %v611_v22  ;;  %vm362_vm0 = vcmp.eq.f32.partialorder %v788_v20, 0.0  ;;  %v363_v58 = vand.u32 2147483648, %v788_v20  ;;  %v41_v22 = vld [vmem:[%s959_s1 + $0x48] sm:$0xff] }
 0x1e5   :  { %v626_v26 = vpop.eup %625  ;;  %v345_v27 = vmul.f32 %v624_v23, %v320_v63  ;;  %v612_v28 = vpop.f32.mrb[10].mxu1  ;;  %v302_v60 = vsub.f32 %v40_v52, %v279_v25  ;;  %vm381_vm2 = vcmp.eq.f32.partialorder %v792_v31, inf  ;;  %v384_v8 = vand.u32 2147483648, %v792_v31 }
 0x1e6   :  { %v331_v30 = vmul.f32 %v626_v26, %v318_v1  ;;  %v794_v32 = vpop.f32.mrb[11].mxu1  ;;  %v628_v35 = vpop.eup %627  ;;  %v316_v59 = vmul.f32 %v304_v50, %v304_v50  ;;  %v305_v61 = vsub.f32 %v43_v53, %v612_v28  ;;  %v370_v21 = vand.u32 2147483648, %v799_v38 }
 0x1e7   :  { %v347_v33 = vsel %vm346_vm5, %v320_v63, %v345_v27  ;;  %v630_v39 = vpop.eup %629  ;;  %v352_v41 = vmul.f32 %v628_v35, %v321_v6  ;;  %v314_v10 = vmul.f32 %v302_v60, %v302_v60 }
 0x1e8   :  { %v796_v36 = vsel %vm348_vm6, %v349_v29, %v347_v33  ;;  %v333_v37 = vsel %vm332_vm7, %v318_v1, %v331_v30  ;;  %v338_v42 = vmul.f32 %v630_v39, %v319_v7  ;;  %vm383_vm7 = vcmp.eq.f32.partialorder %v792_v31, 0.0 }
 0x1e9   :  { %637 = vrsqrt.f32 %v796_v36  ;;  %v802_v40 = vsel %vm334_vm8, %v335_v34, %v333_v37  ;;  %v354_v46 = vsel %vm353_vm9, %v321_v6, %v352_v41  ;;  %vm430_vm1 = vcmp.eq.f32.partialorder %v796_v36, inf }
 0x1ea   :  { %639 = vrsqrt.f32 %v802_v40  ;;  %v340_v47 = vsel %vm339_vm11, %v319_v7, %v338_v42  ;;  %v809_v48 = vsel %vm355_vm10, %v356_v44, %v354_v46  ;;  %v433_v2 = vand.u32 2147483648, %v796_v36 }
 0x1eb   :  { %641 = vrsqrt.f32 %v799_v38  ;;  %v811_v49 = vsel %vm341_vm12, %v342_v45, %v340_v47  ;;  %vm432_vm4 = vcmp.eq.f32.partialorder %v796_v36, 0.0  ;;  %vm416_vm5 = vcmp.eq.f32.partialorder %v802_v40, inf }
 0x1ec   :  { %v632_v51 = vpop.eup %631  ;;  %643 = vrsqrt.f32 %v809_v48  ;;  %vm418_vm6 = vcmp.eq.f32.partialorder %v802_v40, 0.0  ;;  %v419_v6 = vand.u32 2147483648, %v802_v40  ;;  %v848_v9 = vadd.f32 1e-18, %v316_v59 }
 0x1ed   :  { %v634_v54 = vpop.eup %633  ;;  %645 = vrsqrt.f32 %v811_v49  ;;  %v373_v56 = vmul.f32 %v632_v51, %v786_v19  ;;  %vm367_vm8 = vcmp.eq.f32.partialorder %v799_v38, inf  ;;  %vm369_vm9 = vcmp.eq.f32.partialorder %v799_v38, 0.0 }
 0x1ee   :  { %v359_v57 = vmul.f32 %v634_v54, %v788_v20  ;;  %v636_v62 = vpop.eup %635  ;;  %vm437_vm10 = vcmp.eq.f32.partialorder %v809_v48, inf  ;;  %vm423_vm11 = vcmp.eq.f32.partialorder %v811_v49, inf  ;;  %vm425_vm12 = vcmp.eq.f32.partialorder %v811_v49, 0.0 }
 0x1ef   :  { %v375_v63 = vsel %vm374_vm13, %v786_v19, %v373_v56  ;;  %v380_v5 = vmul.f32 %v636_v62, %v792_v31  ;;  %v879_v26 = vadd.f32 1e-18, %v314_v10  ;;  %v426_v28 = vand.u32 2147483648, %v811_v49 }
 0x1f0   :  { %v361_v0 = vsel %vm360_vm15, %v788_v20, %v359_v57  ;;  %v836_v3 = vsel %vm376_vm14, %v377_v55, %v375_v63  ;;  %v317_v30 = vmul.f32 %v305_v61, %v305_v61  ;;  %v303_v34 = vsub.f32 %v41_v22, %v794_v32 }
 0x1f1   :  { %v838_v4 = vsel %vm362_vm0, %v363_v58, %v361_v0  ;;  %v382_v14 = vsel %vm381_vm2, %v792_v31, %v380_v5  ;;  %v440_v37 = vand.u32 2147483648, %v809_v48  ;;  %vm439_vm13 = vcmp.eq.f32.partialorder %v809_v48, 0.0 }
 0x1f2   :  { %647 = vrsqrt.f32 %v838_v4  ;;  %v856_v15 = vsel %vm383_vm7, %v384_v8, %v382_v14  ;;  %v902_v32 = vadd.f32 1e-18, %v317_v30  ;;  %v315_v46 = vmul.f32 %v303_v34, %v303_v34 }
 0x1f3   :  { %v638_v1 = vpop.eup %637  ;;  %649 = vrsqrt.f32 %v836_v3  ;;  %vm444_vm14 = vcmp.eq.f32.partialorder %v838_v4, inf  ;;  %vm446_vm15 = vcmp.eq.f32.partialorder %v838_v4, 0.0  ;;  %vm458_vm0 = vcmp.eq.f32.partialorder %v836_v3, inf }
 0x1f4   :  { %v640_v7 = vpop.eup %639  ;;  %v429_v12 = vmul.f32 %v638_v1, %v796_v36  ;;  %651 = vrsqrt.f32 %v856_v15  ;;  %v327_v57 = vadd.f32 1e-18, %v315_v46  ;;  %v461_v58 = vand.u32 2147483648, %v836_v3 }
 0x1f5   :  { %v642_v11 = vpop.eup %641  ;;  %v415_v13 = vmul.f32 %v640_v7, %v802_v40  ;;  %653 = vrsqrt.f32 %v848_v9  ;;  %vm465_vm2 = vcmp.eq.f32.partialorder %v856_v15, inf  ;;  %v468_v62 = vand.u32 2147483648, %v856_v15 }
 0x1f6   :  { %v366_v16 = vmul.f32 %v642_v11, %v799_v38  ;;  %v644_v17 = vpop.eup %643  ;;  %v431_v23 = vsel %vm430_vm1, %v796_v36, %v429_v12  ;;  %vm460_vm1 = vcmp.eq.f32.partialorder %v836_v3, 0.0  ;;  %v405_v5 = vand.u32 2147483648, %v848_v9 }
 0x1f7   :  { %v417_v18 = vsel %vm416_vm5, %v802_v40, %v415_v13  ;;  %v646_v19 = vpop.eup %645  ;;  %v436_v20 = vmul.f32 %v644_v17, %v809_v48  ;;  %v434_v35 = vsel %vm432_vm4, %v433_v2, %v431_v23  ;;  %vm467_vm4 = vcmp.eq.f32.partialorder %v856_v15, 0.0 }
 0x1f8   :  { %v422_v24 = vmul.f32 %v646_v19, %v811_v49  ;;  %v368_v25 = vsel %vm367_vm8, %v799_v38, %v366_v16  ;;  %v420_v27 = vsel %vm418_vm6, %v419_v6, %v417_v18  ;;  %v502_v44 = vsel %vm498_vm3, %v434_v35, 0.0 }
 0x1f9   :  { %v371_v29 = vsel %vm369_vm9, %v370_v21, %v368_v25  ;;  %v438_v31 = vsel %vm437_vm10, %v809_v48, %v436_v20  ;;  %v499_v39 = vsel %vm498_vm3, %v420_v27, 0.0  ;;  %v447_v48 = vand.u32 2147483648, %v838_v4 }
 0x1fa   :  { %v424_v33 = vsel %vm423_vm11, %v811_v49, %v422_v24  ;;  %655 = vrsqrt.f32 %v371_v29  ;;  %v441_v42 = vsel %vm439_vm13, %v440_v37, %v438_v31  ;;  %vm402_vm5 = vcmp.eq.f32.partialorder %v848_v9, inf }
 0x1fb   :  { %v427_v38 = vsel %vm425_vm12, %v426_v28, %v424_v33  ;;  %657 = vrsqrt.f32 %v879_v26  ;;  %v504_v50 = vsel %vm498_vm3, %v441_v42, 0.0  ;;  %vm404_vm6 = vcmp.eq.f32.partialorder %v848_v9, 0.0 }
 0x1fc   :  { %v500_v40 = vsel %vm498_vm3, %v427_v38, 0.0  ;;  %v648_v41 = vpop.eup %647  ;;  %659 = vrsqrt.f32 %v902_v32  ;;  %vm451_vm7 = vcmp.eq.f32.partialorder %v371_v29, inf  ;;  %vm453_vm8 = vcmp.eq.f32.partialorder %v371_v29, 0.0 }
 0x1fd   :  { %v501_v43 = vadd.f32 %v500_v40, %v499_v39  ;;  %v650_v36 = vpop.eup %649  ;;  %v443_v45 = vmul.f32 %v648_v41, %v838_v4  ;;  %661 = vrsqrt.f32 %v327_v57  ;;  %vm388_vm9 = vcmp.eq.f32.partialorder %v879_v26, inf }
 0x1fe   :  { %v652_v49 = vpop.eup %651  ;;  %v457_v53 = vmul.f32 %v650_v36, %v836_v3  ;;  %v391_v13 = vand.u32 2147483648, %v879_v26  ;;  %vm390_vm10 = vcmp.eq.f32.partialorder %v879_v26, 0.0  ;;  %vm409_vm11 = vcmp.eq.f32.partialorder %v902_v32, inf }
 0x1ff   :  { %v503_v47 = vadd.f32 %v502_v44, %v501_v43  ;;  %v445_v51 = vsel %vm444_vm14, %v838_v4, %v443_v45  ;;  %v654_v52 = vpop.eup %653  ;;  %v464_v60 = vmul.f32 %v652_v49, %v856_v15  ;;  %v454_v4 = vand.u32 2147483648, %v371_v29 }
 0x200   :  { %v448_v54 = vsel %vm446_vm15, %v447_v48, %v445_v51  ;;  %v401_v63 = vmul.f32 %v654_v52, %v848_v9  ;;  %v459_v0 = vsel %vm458_vm0, %v836_v3, %v457_v53  ;;  %v412_v23 = vand.u32 2147483648, %v902_v32 }
 0x201   :  { %v505_v55 = vadd.f32 %v504_v50, %v503_v47  ;;  %v506_v56 = vsel %vm498_vm3, %v448_v54, 0.0  ;;  %v466_v6 = vsel %vm465_vm2, %v856_v15, %v464_v60  ;;  %v462_v10 = vsel %vm460_vm1, %v461_v58, %v459_v0 }
 0x202   :  { %v403_v12 = vsel %vm402_vm5, %v848_v9, %v401_v63  ;;  %v469_v3 = vsel %vm467_vm4, %v468_v62, %v466_v6  ;;  %v510_v21 = vsel %vm498_vm3, %v462_v10, 0.0  ;;  %vm411_vm12 = vcmp.eq.f32.partialorder %v902_v32, 0.0 }
 0x203   :  { %v507_v59 = vadd.f32 %v506_v56, %v505_v55  ;;  %v406_v22 = vsel %vm404_vm6, %v405_v5, %v403_v12  ;;  %v512_v15 = vsel %vm498_vm3, %v469_v3, 0.0  ;;  %vm395_vm13 = vcmp.eq.f32.partialorder %v327_v57, inf }
 0x204   :  { %v656_v61 = vpop.eup %655  ;;  %v398_v30 = vand.u32 2147483648, %v327_v57  ;;  %vm397_vm14 = vcmp.eq.f32.partialorder %v327_v57, 0.0  ;;  %vm486_vm1 = vcmp.eq.f32.partialorder %v406_v22, inf  ;;  %v489_v46 = vand.u32 2147483648, %v406_v22 }
 0x205   :  { %v450_v1 = vmul.f32 %v656_v61, %v371_v29  ;;  %v658_v2 = vpop.eup %657  ;;  %vm488_vm5 = vcmp.eq.f32.partialorder %v406_v22, 0.0 }
 0x206   :  { %v387_v8 = vmul.f32 %v658_v2, %v879_v26  ;;  %v660_v14 = vpop.eup %659 }
 0x207   :  { %v452_v7 = vsel %vm451_vm7, %v371_v29, %v450_v1  ;;  %v408_v20 = vmul.f32 %v660_v14, %v902_v32  ;;  %v662_v28 = vpop.eup %661 }
 0x208   :  { %v455_v11 = vsel %vm453_vm8, %v454_v4, %v452_v7  ;;  %v389_v17 = vsel %vm388_vm9, %v879_v26, %v387_v8  ;;  %v394_v29 = vmul.f32 %v662_v28, %v327_v57  ;;  %vm528_vm8 = vcmask 122880  }
 0x209   :  { %v508_v16 = vsel %vm498_vm3, %v455_v11, 0.0  ;;  %v392_v19 = vsel %vm390_vm10, %v391_v13, %v389_v17  ;;  %v410_v25 = vsel %vm409_vm11, %v902_v32, %v408_v20 }
 0x20a   :  { %v509_v18 = vadd.f32 %v508_v16, %v507_v59  ;;  %663 = vrsqrt.f32 %v392_v19  ;;  %v413_v26 = vsel %vm411_vm12, %v412_v23, %v410_v25  ;;  %v396_v9 = vsel %vm395_vm13, %v327_v57, %v394_v29 }
 0x20b   :  { %665 = vrsqrt.f32 %v406_v22  ;;  %v399_v31 = vsel %vm397_vm14, %v398_v30, %v396_v9  ;;  %vm472_vm15 = vcmp.eq.f32.partialorder %v392_v19, inf  ;;  %v475_v35 = vand.u32 2147483648, %v392_v19 }
 0x20c   :  { %v511_v24 = vadd.f32 %v510_v21, %v509_v18  ;;  %667 = vrsqrt.f32 %v413_v26  ;;  %vm474_vm0 = vcmp.eq.f32.partialorder %v392_v19, 0.0  ;;  %vm493_vm2 = vcmp.eq.f32.partialorder %v413_v26, inf }
 0x20d   :  { %669 = vrsqrt.f32 %v399_v31  ;;  %vm479_vm4 = vcmp.eq.f32.partialorder %v399_v31, inf  ;;  %v482_v47 = vand.u32 2147483648, %v399_v31  ;;  %vm481_vm6 = vcmp.eq.f32.partialorder %v399_v31, 0.0 }
 0x20e   :  { %v513_v27 = vadd.f32 %v512_v15, %v511_v24  ;;  %v496_v51 = vand.u32 2147483648, %v413_v26  ;;  %vm495_vm7 = vcmp.eq.f32.partialorder %v413_v26, 0.0 }
 0x214   :  { %v664_v33 = vpop.eup %663 }
 0x215   :  { %v471_v34 = vmul.f32 %v664_v33, %v392_v19  ;;  %v666_v37 = vpop.eup %665 }
 0x216   :  { %v668_v40 = vpop.eup %667  ;;  %v485_v42 = vmul.f32 %v666_v37, %v406_v22 }
 0x217   :  { %v473_v38 = vsel %vm472_vm15, %v392_v19, %v471_v34  ;;  %v492_v32 = vmul.f32 %v668_v40, %v413_v26  ;;  %v670_v36 = vpop.eup %669 }
 0x218   :  { %v476_v39 = vsel %vm474_vm0, %v475_v35, %v473_v38  ;;  %v487_v44 = vsel %vm486_vm1, %v406_v22, %v485_v42  ;;  %v478_v45 = vmul.f32 %v670_v36, %v399_v31 }
 0x219   :  { %v514_v41 = vsel %vm498_vm3, %v476_v39, 0.0  ;;  %v494_v48 = vsel %vm493_vm2, %v413_v26, %v492_v32  ;;  %v490_v50 = vsel %vm488_vm5, %v489_v46, %v487_v44 }
 0x21a   :  { %v515_v43 = vadd.f32 %v514_v41, %v513_v27  ;;  %v480_v49 = vsel %vm479_vm4, %v399_v31, %v478_v45  ;;  %v497_v54 = vsel %vm495_vm7, %v496_v51, %v494_v48  ;;  %v518_v56 = vsel %vm498_vm3, %v490_v50, 0.0 }
 0x21b   :  { %v483_v52 = vsel %vm481_vm6, %v482_v47, %v480_v49  ;;  %v520_v58 = vsel %vm498_vm3, %v497_v54, 0.0 }
 0x21c   :  { %v516_v53 = vsel %vm498_vm3, %v483_v52, 0.0 }
 0x21d   :  { %v517_v55 = vadd.f32 %v516_v53, %v515_v43 }
 0x21f   :  { %v519_v57 = vadd.f32 %v518_v56, %v517_v55 }
 0x221   :  { %v521_v59 = vadd.f32 %v520_v58, %v519_v57 }
 0x223   :  { %v522_v60 = vrot.slane %v521_v59, 4 }
 0x225   :  { %v523_v61 = vadd.f32 %v522_v60, %v521_v59 }
 0x227   :  { %v524_v62 = vrot.slane %v523_v61, 2 }
 0x229   :  { %v525_v63 = vadd.f32 %v524_v62, %v523_v61 }
 0x22b   :  { %v526_v0 = vrot.slane %v525_v63, 1 }
 0x22d   :  { %v527_v1 = vadd.f32 %v526_v0, %v525_v63 }
 0x22f   :  { %529 = vst.msk [vmem:[%s960_s4] sm:$0x1] %vm528_vm8, %v527_v1 }

</bundles_post_ra>
